<compile_context>
chip_gen: v7x
topology: tpu7x:2x2x1
jax: 0.10.0
libtpu: 0.0.40
codegen_flags: <defaults>
</compile_context>

<pallas_src>
import jax
import jax.numpy as jnp
from jax.experimental import pallas as pl
from jax.experimental.pallas import tpu as pltpu  # noqa: F401 (TPU backend)

# ---------------- problem sizes (small, synthetic) ----------------
N = 2              # batch
C_IN = 3           # input channels (image)
H = W = 16         # spatial
K = 3              # conv kernel size (padding=1 -> "same")
C_HID = 32         # backbone out_features (per branch)
NUM_CLASSES = 1    # binary-class head (f)
NUM_DOMAINS = 4    # domain head (g)
OUT_DIM = NUM_CLASSES + NUM_DOMAINS
OUT_PAD = 128      # lane-dense output width (sliced back to OUT_DIM outside)
HW = H * W
M = N * HW         # 512 rows -> one tall MXU LHS
P = K * K * C_IN   # im2col patch length (27)
P_BIAS = P         # column index of the folded-bias ones column
P_PAD = 64         # padded patch length: 27 cols + 1 ones col + zero pad
C2 = 2 * C_HID     # fused f+g conv output channels (64)
C2_PAD = 128       # lane-dense fused conv channels


# ---------------- Pallas kernel (single invocation) ----------------
def heckman_kernel(p_ref, cw_ref, hw_ref, hb_ref, o_ref):
    # p_ref : (M, P_PAD)        bf16  im2col patches | ones col (bias) | zeros
    # cw_ref: (P_PAD, C2_PAD)   bf16  fused [f|g] conv weights, bias row folded in
    # hw_ref: (C2_PAD, OUT_PAD) bf16  block-diagonal fused head weights (zero-padded)
    # hb_ref: (1, OUT_PAD)      f32   fused head bias (zero-padded)
    # o_ref : (N, OUT_PAD)      f32   lane-dense output

    # conv (+ folded bias) for BOTH branches in one bf16 MXU matmul, f32 acc
    h = jnp.dot(p_ref[...], cw_ref[...], preferred_element_type=jnp.float32)
    h = jnp.maximum(h, 0.0)                              # ReLU in f32 (VPU)

    # global average pool per image: sublane-split reshape + XLU reduce
    pooled = jnp.sum(h.reshape(N, HW, C2_PAD), axis=1) * (1.0 / HW)  # (N, C2_PAD) f32

    # fused block-diagonal heads on the bf16 MXU path, f32 accumulate
    o_ref[...] = jnp.dot(pooled.astype(jnp.bfloat16), hw_ref[...],
                         preferred_element_type=jnp.float32) + hb_ref[...]


# ---------------- glue: NCHW -> im2col patches ----------------
def _im2col(x_nchw):
    """(N, C, H, W) -> (M, P) float32, 'same'-padded 3x3 patches."""
    # TODO(synk): at realistic image sizes move im2col into the kernel
    # (9 shifted VMEM slices / shifted matmuls) to avoid the 9x HBM blowup.
    x = jnp.transpose(x_nchw, (0, 2, 3, 1))                      # (N, H, W, C)
    pad = K // 2
    xp = jnp.pad(x, ((0, 0), (pad, pad), (pad, pad), (0, 0)))
    shards = [xp[:, i:i + H, j:j + W, :] for i in range(K) for j in range(K)]
    patches = jnp.stack(shards, axis=-2)                         # (N,H,W,K*K,C)
    return patches.reshape(M, P).astype(jnp.float32)


# ---------------- one-time parameter preparation (hoisted out of forward) ----
def prepare_params(params):
    """Fuse/pad/cast weights once; returns device constants reused every call."""
    cwf, cbf, hwf, hbf, cwg, cbg, hwg, hbg = params

    # fused conv weight, bias folded in as the P_BIAS row, zero-padded lane-dense
    cw = jnp.zeros((P_PAD, C2_PAD), jnp.float32)
    cw = cw.at[:P, :C_HID].set(cwf)
    cw = cw.at[:P, C_HID:C2].set(cwg)
    cw = cw.at[P_BIAS, :C_HID].set(cbf[0])
    cw = cw.at[P_BIAS, C_HID:C2].set(cbg[0])
    cw = cw.astype(jnp.bfloat16)

    # block-diagonal fused head weights, zero-padded, bf16 for the MXU
    hw_bd = jnp.zeros((C2_PAD, OUT_PAD), jnp.float32)
    hw_bd = hw_bd.at[:C_HID, :NUM_CLASSES].set(hwf)
    hw_bd = hw_bd.at[C_HID:C2, NUM_CLASSES:OUT_DIM].set(hwg)
    hw_bd = hw_bd.astype(jnp.bfloat16)

    hb_pad = jnp.zeros((1, OUT_PAD), jnp.float32)
    hb_pad = hb_pad.at[:, :NUM_CLASSES].set(hbf)
    hb_pad = hb_pad.at[:, NUM_CLASSES:OUT_DIM].set(hbg)

    return cw, hw_bd, hb_pad


# ---------------- wrapper ----------------
@jax.jit
def heckman_forward(x_nchw, cw, hw_bd, hb_pad):
    """x_nchw: (N, C_IN, H, W) f32; prepared weights from prepare_params."""
    # im2col + ones column (folded bias) + zero pad to 128-byte bf16 rows
    patches = _im2col(x_nchw)                                   # (M, P) f32
    ones = jnp.ones((M, 1), jnp.float32)
    zpad = jnp.zeros((M, P_PAD - P - 1), jnp.float32)
    patches = jnp.concatenate([patches, ones, zpad], axis=1).astype(jnp.bfloat16)

    flops = 2 * M * P_PAD * C2_PAD + M * C2_PAD + 2 * N * C2_PAD * OUT_PAD
    bytes_accessed = (M * P_PAD * 2 + P_PAD * C2_PAD * 2
                      + C2_PAD * OUT_PAD * 2 + OUT_PAD * 4 + N * OUT_PAD * 4)

    out_padded = pl.pallas_call(
        heckman_kernel,
        out_shape=jax.ShapeDtypeStruct((N, OUT_PAD), jnp.float32),
        grid=(1,),  # single invocation: whole problem fits comfortably in VMEM
        in_specs=[
            pl.BlockSpec((M, P_PAD), lambda i: (0, 0)),
            pl.BlockSpec((P_PAD, C2_PAD), lambda i: (0, 0)),
            pl.BlockSpec((C2_PAD, OUT_PAD), lambda i: (0, 0)),
            pl.BlockSpec((1, OUT_PAD), lambda i: (0, 0)),
        ],
        out_specs=pl.BlockSpec((N, OUT_PAD), lambda i: (0, 0)),
        cost_estimate=pl.CostEstimate(flops=flops, transcendentals=0,
                                      bytes_accessed=bytes_accessed),
    )(patches, cw, hw_bd, hb_pad)

    return out_padded[:, :OUT_DIM]


# ---------------- pure-JAX reference (un-fused f/g branches + concat) --------
def heckman_reference(x_nchw, params):
    cwf, cbf, hwf, hbf, cwg, cbg, hwg, hbg = params
    patches = _im2col(x_nchw).reshape(N, HW, P)
    pt = patches.astype(jnp.bfloat16)           # same MXU-input dtype as kernel

    def branch(cw, cb, hw, hb):
        h = jnp.einsum('nmp,pc->nmc', pt, cw.astype(jnp.bfloat16),
                       preferred_element_type=jnp.float32) + cb
        h = jnp.maximum(h, 0.0)
        pooled = jnp.mean(h, axis=1)             # (N, C_HID) f32
        return jnp.dot(pooled.astype(jnp.bfloat16), hw.astype(jnp.bfloat16),
                       preferred_element_type=jnp.float32) + hb

    f = branch(cwf, cbf, hwf, hbf)               # (N, NUM_CLASSES)
    g = branch(cwg, cbg, hwg, hbg)               # (N, NUM_DOMAINS)
    return jnp.concatenate([f, g], axis=1)       # (N, OUT_DIM)


# ---------------- deterministic parameter init ----------------
def init_params(key):
    ks = jax.random.split(key, 8)
    scale_conv = 1.0 / jnp.sqrt(P)
    scale_head = 1.0 / jnp.sqrt(C_HID)
    # conv weights stored as (K*K*C_in, C_out), matching the patch ordering
    cwf = jax.random.normal(ks[0], (P, C_HID), jnp.float32) * scale_conv
    cbf = jax.random.normal(ks[1], (1, C_HID), jnp.float32) * 0.01
    hwf = jax.random.normal(ks[2], (C_HID, NUM_CLASSES), jnp.float32) * scale_head
    hbf = jax.random.normal(ks[3], (1, NUM_CLASSES), jnp.float32) * 0.01
    cwg = jax.random.normal(ks[4], (P, C_HID), jnp.float32) * scale_conv
    cbg = jax.random.normal(ks[5], (1, C_HID), jnp.float32) * 0.01
    hwg = jax.random.normal(ks[6], (C_HID, NUM_DOMAINS), jnp.float32) * scale_head
    hbg = jax.random.normal(ks[7], (1, NUM_DOMAINS), jnp.float32) * 0.01
    return (cwf, cbf, hwf, hbf, cwg, cbg, hwg, hbg)


if __name__ == "__main__":
    key = jax.random.PRNGKey(0)
    k_x, k_p = jax.random.split(key)
    x = jax.random.normal(k_x, (N, C_IN, H, W), jnp.float32)  # NCHW like PyTorch
    params = init_params(k_p)
    # rho parameter exists in the module but is unused in forward:
    rho = jnp.zeros((NUM_DOMAINS,), jnp.float32)  # noqa: F841

    prepared = prepare_params(params)   # one-time prep, NOT re-done per forward
    out = heckman_forward(x, *prepared)
    out = jax.block_until_ready(out)

    ref = heckman_reference(x, params)
    assert out.shape == (N, OUT_DIM)
    assert jnp.allclose(out, ref, atol=2e-3, rtol=2e-3), (out, ref)
    print("KERNEL_OK")
</pallas_src>

<mosaic_0001>
module attributes {stable_mosaic.version = 11 : i64} {
  func.func @heckman_kernel(%arg0: i32, %arg1: memref<512x64xbf16, #tpu.memory_space<vmem>>, %arg2: memref<64x128xbf16, #tpu.memory_space<vmem>>, %arg3: memref<128x128xbf16, #tpu.memory_space<vmem>>, %arg4: memref<1x128xf32, #tpu.memory_space<vmem>>, %arg5: memref<2x128xf32, #tpu.memory_space<vmem>>) attributes {dimension_semantics = [#tpu.dimension_semantics<arbitrary>], iteration_bounds = array<i64: 1>, scalar_prefetch = 0 : i64, scratch_operands = 0 : i64, tpu.core_type = #tpu.core_type<tc>, window_params = [{pipeline_mode = #tpu.pipeline_mode<synchronous>, transform_indices = @transform_0, window_bounds = array<i64: 512, 64>}, {pipeline_mode = #tpu.pipeline_mode<synchronous>, transform_indices = @transform_1, window_bounds = array<i64: 64, 128>}, {pipeline_mode = #tpu.pipeline_mode<synchronous>, transform_indices = @transform_2, window_bounds = array<i64: 128, 128>}, {pipeline_mode = #tpu.pipeline_mode<synchronous>, transform_indices = @transform_3, window_bounds = array<i64: 1, 128>}, {pipeline_mode = #tpu.pipeline_mode<synchronous>, transform_indices = @transform_4, window_bounds = array<i64: 2, 128>}]} {
    %c0 = arith.constant 0 : index
    %c0_0 = arith.constant 0 : index
    %0 = vector.load %arg1[%c0, %c0_0] : memref<512x64xbf16, #tpu.memory_space<vmem>>, vector<512x64xbf16>
    %c0_1 = arith.constant 0 : index
    %c0_2 = arith.constant 0 : index
    %1 = vector.load %arg2[%c0_1, %c0_2] : memref<64x128xbf16, #tpu.memory_space<vmem>>, vector<64x128xbf16>
    %cst = arith.constant dense<0.000000e+00> : vector<512x128xf32>
    %2 = tpu.matmul %0, %1, %cst {dimension_numbers = #tpu.dot_dimension_numbers<[1], [0], [0], [1], [0, 0, 1, 1], [], []>} : vector<512x64xbf16>, vector<64x128xbf16>, vector<512x128xf32> -> vector<512x128xf32>
    %cst_3 = arith.constant 0.000000e+00 : f32
    %3 = vector.broadcast %cst_3 : f32 to vector<512x128xf32>
    %4 = arith.maximumf %2, %3 : vector<512x128xf32>
    %5 = vector.shape_cast %4 : vector<512x128xf32> to vector<2x256x128xf32>
    %cst_4 = arith.constant dense<0.000000e+00> : vector<2x128xf32>
    %6 = vector.multi_reduction <add>, %5, %cst_4 [1] : vector<2x256x128xf32> to vector<2x128xf32>
    %cst_5 = arith.constant 3.906250e-03 : f32
    %7 = vector.broadcast %cst_5 : f32 to vector<2x128xf32>
    %8 = arith.mulf %6, %7 : vector<2x128xf32>
    %9 = arith.truncf %8 : vector<2x128xf32> to vector<2x128xbf16>
    %c0_6 = arith.constant 0 : index
    %c0_7 = arith.constant 0 : index
    %10 = vector.load %arg3[%c0_6, %c0_7] : memref<128x128xbf16, #tpu.memory_space<vmem>>, vector<128x128xbf16>
    %cst_8 = arith.constant dense<0.000000e+00> : vector<2x128xf32>
    %11 = tpu.matmul %9, %10, %cst_8 {dimension_numbers = #tpu.dot_dimension_numbers<[1], [0], [0], [1], [0, 0, 1, 1], [], []>} : vector<2x128xbf16>, vector<128x128xbf16>, vector<2x128xf32> -> vector<2x128xf32>
    %c0_9 = arith.constant 0 : index
    %c0_10 = arith.constant 0 : index
    %12 = vector.load %arg4[%c0_9, %c0_10] : memref<1x128xf32, #tpu.memory_space<vmem>>, vector<1x128xf32>
    %13 = vector.broadcast %12 : vector<1x128xf32> to vector<2x128xf32>
    %14 = arith.addf %11, %13 : vector<2x128xf32>
    %c0_11 = arith.constant 0 : index
    %c0_12 = arith.constant 0 : index
    %15 = vector.load %arg5[%c0_11, %c0_12] : memref<2x128xf32, #tpu.memory_space<vmem>>, vector<2x128xf32>
    tpu.vector_store %arg5[%c0_11, %c0_12], %14 {strides = array<i32>} : memref<2x128xf32, #tpu.memory_space<vmem>>, vector<2x128xf32>,
    return
  }
  func.func @transform_0(%arg0: i32) -> (i32, i32) {
    %c0_i32 = arith.constant 0 : i32
    %c0_i32_0 = arith.constant 0 : i32
    %c0_i32_1 = arith.constant 0 : i32
    return %c0_i32, %c0_i32_0 : i32, i32
  }
  func.func @transform_1(%arg0: i32) -> (i32, i32) {
    %c0_i32 = arith.constant 0 : i32
    %c0_i32_0 = arith.constant 0 : i32
    %c0_i32_1 = arith.constant 0 : i32
    return %c0_i32, %c0_i32_0 : i32, i32
  }
  func.func @transform_2(%arg0: i32) -> (i32, i32) {
    %c0_i32 = arith.constant 0 : i32
    %c0_i32_0 = arith.constant 0 : i32
    %c0_i32_1 = arith.constant 0 : i32
    return %c0_i32, %c0_i32_0 : i32, i32
  }
  func.func @transform_3(%arg0: i32) -> (i32, i32) {
    %c0_i32 = arith.constant 0 : i32
    %c0_i32_0 = arith.constant 0 : i32
    %c0_i32_1 = arith.constant 0 : i32
    return %c0_i32, %c0_i32_0 : i32, i32
  }
  func.func @transform_4(%arg0: i32) -> (i32, i32) {
    %c0_i32 = arith.constant 0 : i32
    %c0_i32_0 = arith.constant 0 : i32
    %c0_i32_1 = arith.constant 0 : i32
    return %c0_i32, %c0_i32_0 : i32, i32
  }
}

</mosaic_0001>

<bundles_post_ra>
// kernel: heckman_forward.1
= control target key start
LH: loop header
LB: loop body
LE: loop exit
PB: predicated region body
PF: predicated region fallthrough
CT: control target
= control target key end

     0   :  { %vm275_vm0 = vcmask 523264   ;;  %s1521_s0 = inlined_call_operand.vmem [shape: bf16[512,64], index: 0, kind: input, shape index: {}]   ;;  %s1522_s1 = inlined_call_operand.vmem [shape: bf16[64,128], index: 1, kind: input, shape index: {}]   ;;  %s1523_s2 = inlined_call_operand.vmem [shape: bf16[128,128], index: 2, kind: input, shape index: {}]   ;;  %s1524_s3 = inlined_call_operand.vmem [shape: f32[1,128], index: 3, kind: input, shape index: {}]   ;;  %s1525_s4 = inlined_call_operand.hbm [shape: f32[2,128], index: 4, kind: output, shape index: {}]  }
   0x1   :  { %v1162_v0 = vld [vmem:[%s1522_s1] sm:$0xff]   ;;  %v1163_v1 = vld [vmem:[%s1522_s1 + $0x8] sm:$0xff]   ;;  %v1164_v2 = vld [vmem:[%s1522_s1 + $0x10] sm:$0xff]  }
   0x2   :  { %1059 = vmatprep.subr.bf16.mxu0 %v1162_v0  ;;  %1151 = vmatprep.subr.bf16.mxu1 %v1162_v0  ;;  %v1166_v3 = vld [vmem:[%s1521_s0] sm:$0xff]   ;;  %v1165_v4 = vld [vmem:[%s1522_s1 + $0x18] sm:$0xff]   ;;  %v1167_v5 = vld [vmem:[%s1521_s0 + $0x8] sm:$0xff]  }
   0x3   :  { %1060 = vmatpush3.bf16.msra.mxu0 %v1162_v0  ;;  %1155 = vmatpush3.bf16.msra.mxu1 %v1162_v0  ;;  %v1168_v6 = vld [vmem:[%s1521_s0 + $0x10] sm:$0xff]   ;;  %v1169_v7 = vld [vmem:[%s1521_s0 + $0x18] sm:$0xff]   ;;  %v1170_v8 = vld [vmem:[%s1521_s0 + $0x20] sm:$0xff]  }
   0x4   :  { %1061 = vmatprep.subr.bf16.mxu0 %v1163_v1  ;;  %1152 = vmatprep.subr.bf16.mxu1 %v1163_v1  ;;  %v1184_v9 = vld [vmem:[%s1521_s0 + $0x90] sm:$0xff]   ;;  %v1185_v10 = vld [vmem:[%s1521_s0 + $0x98] sm:$0xff]   ;;  %v1186_v11 = vld [vmem:[%s1521_s0 + $0xa0] sm:$0xff]  }
   0x5   :  { %1067 = vmatprep.mubr.msk.bf16.mxu0 %vm275_vm0, %v1166_v3  ;;  %1103 = vmatprep.mubr.msk.bf16.mxu1 %vm275_vm0, %v1184_v9  ;;  %v1171_v12 = vld [vmem:[%s1521_s0 + $0x28] sm:$0xff]   ;;  %v1188_v14 = vld [vmem:[%s1521_s0 + $0xb0] sm:$0xff]   ;;  %v1189_v16 = vld [vmem:[%s1521_s0 + $0xb8] sm:$0xff]  }
   0x6   :  { %v1187_v13 = vld [vmem:[%s1521_s0 + $0xa8] sm:$0xff]   ;;  %v1172_v15 = vld [vmem:[%s1521_s0 + $0x30] sm:$0xff]   ;;  %v1173_v17 = vld [vmem:[%s1521_s0 + $0x38] sm:$0xff]  }
   0x7   :  { %1062 = vmatpush3.bf16.msra.mxu0 %v1163_v1  ;;  %1156 = vmatpush3.bf16.msra.mxu1 %v1163_v1  ;;  %v1190_v18 = vld [vmem:[%s1521_s0 + $0xc0] sm:$0xff]  }
   0x8   :  { %1063 = vmatprep.subr.bf16.mxu0 %v1164_v2  ;;  %1153 = vmatprep.subr.bf16.mxu1 %v1164_v2  ;;  %v1174_v19 = vld [vmem:[%s1521_s0 + $0x40] sm:$0xff]  }
   0xb   :  { %1064 = vmatpush3.bf16.msra.mxu0 %v1164_v2  ;;  %1157 = vmatpush3.bf16.msra.mxu1 %v1164_v2 }
   0xc   :  { %1065 = vmatprep.subr.bf16.mxu0 %v1165_v4  ;;  %1154 = vmatprep.subr.bf16.mxu1 %v1165_v4 }
   0xf   :  { %1066 = vmatpush3.bf16.msra.mxu0 %v1165_v4  ;;  %1158 = vmatpush3.bf16.msra.mxu1 %v1165_v4 }
  0x12   :  { %1068 = vmatmul.mubr.msk.bf16.vlgmr.msra.gmra.mrb[0].mxu0 %vm275_vm0, %v1167_v5  ;;  %1104 = vmatmul.mubr.msk.bf16.vlgmr.msra.gmra.mrb[0].mxu1 %vm275_vm0, %v1185_v10 }
  0x13   :  { %1071 = vmatprep.mubr.msk.bf16.mxu0 %vm275_vm0, %v1168_v6  ;;  %1107 = vmatprep.mubr.msk.bf16.mxu1 %vm275_vm0, %v1186_v11 }
  0x1a   :  { %1072 = vmatmul.mubr.msk.bf16.gmra.mrb[4].mxu0 %vm275_vm0, %v1169_v7  ;;  %1108 = vmatmul.mubr.msk.bf16.gmra.mrb[4].mxu1 %vm275_vm0, %v1187_v13 }
  0x1b   :  { %1075 = vmatprep.mubr.msk.bf16.mxu0 %vm275_vm0, %v1170_v8  ;;  %1111 = vmatprep.mubr.msk.bf16.mxu1 %vm275_vm0, %v1188_v14 }
  0x22   :  { %1076 = vmatmul.mubr.msk.bf16.gmra.mrb[8].mxu0 %vm275_vm0, %v1171_v12  ;;  %1112 = vmatmul.mubr.msk.bf16.gmra.mrb[8].mxu1 %vm275_vm0, %v1189_v16 }
  0x23   :  { %1079 = vmatprep.mubr.msk.bf16.mxu0 %vm275_vm0, %v1172_v15 }
  0x24   :  { %9 = vsyncpa [#allocation3], 0  ;;  %1115 = vmatprep.mubr.msk.bf16.mxu1 %vm275_vm0, %v1190_v18  ;;  %v1191_v20 = vld [vmem:[%s1521_s0 + $0xc8] sm:$0xff]   ;;  %v1192_v22 = vld [vmem:[%s1521_s0 + $0xd0] sm:$0xff]   ;;  %v1230_v37 = vmov 0.0   ;;  %vm1231_vm1 = vmmov 0  }
  0x25   :  { %v1175_v21 = vld [vmem:[%s1521_s0 + $0x48] sm:$0xff]   ;;  %v1176_v23 = vld [vmem:[%s1521_s0 + $0x50] sm:$0xff]   ;;  %v1193_v24 = vld [vmem:[%s1521_s0 + $0xd8] sm:$0xff]   ;;  %1131 = vmatprep.subr.bf16.mxu1 %v1230_v37  ;;  %vm830_vm2 = vcmask 1041409   ;;  %s1232_s22 = smov [#allocation2]  }
  0x26   :  { %v1177_v25 = vld [vmem:[%s1521_s0 + $0x58] sm:$0xff]   ;;  %v1194_v26 = vld [vmem:[%s1521_s0 + $0xe0] sm:$0xff]   ;;  %v1195_v28 = vld [vmem:[%s1521_s0 + $0xe8] sm:$0xff]   ;;  %s929_s23 = sshll.u32 %s1232_s22, 4  ;;  %s930_s23 = int_to_ptr.vmem [resolvable:$true] %s929_s23 }
  0x27   :  { %v1178_v27 = vld [vmem:[%s1521_s0 + $0x60] sm:$0xff]   ;;  %v1179_v29 = vld [vmem:[%s1521_s0 + $0x68] sm:$0xff]   ;;  %v1196_v30 = vld [vmem:[%s1521_s0 + $0xf0] sm:$0xff]   ;;  %s1206_s24 = scalar_lea.vmem %s930_s23, 32  ;;  %p1211_p1 = scmp.lt.s32.totalorder %s930_s23, %s930_s23 }
  0x28   :  { %v1180_v31 = vld [vmem:[%s1521_s0 + $0x70] sm:$0xff]   ;;  %v1197_v32 = vld [vmem:[%s1521_s0 + $0xf8] sm:$0xff]   ;;  %v1182_v34 = vld [vmem:[%s1521_s0 + $0x80] sm:$0xff]   ;;  %p1207_p0 = scmp.ne.s32.totalorder %s930_s23, %s1206_s24  ;;  %p1212_p2 = scmp.lt.s32.totalorder %s1206_s24, %s1206_s24 }
  0x29   :  { %v1181_v33 = vld [vmem:[%s1521_s0 + $0x78] sm:$0xff]   ;;  %v1183_v35 = vld [vmem:[%s1521_s0 + $0x88] sm:$0xff]   ;;  %v1198_v36 = vld [vmem:[%s1523_s2] sm:$0xff]  }
  0x2a   :  { %1080 = vmatmul.mubr.msk.bf16.gmra.mrb[12].mxu0 %vm275_vm0, %v1173_v17  ;;  %1116 = vmatmul.mubr.msk.bf16.gmra.mrb[12].mxu1 %vm275_vm0, %v1191_v20  ;;  %v1199_v38 = vld [vmem:[%s1523_s2 + $0x8] sm:$0xff]   ;;  %v1200_v39 = vld [vmem:[%s1523_s2 + $0x10] sm:$0xff]   ;;  %v1201_v40 = vld [vmem:[%s1523_s2 + $0x18] sm:$0xff]   ;;  %p1213_p3 = por %p1212_p2, %p1211_p1 }
  0x2b   :  { %1083 = vmatprep.mubr.msk.bf16.mxu0 %vm275_vm0, %v1174_v19  ;;  %1119 = vmatprep.mubr.msk.bf16.mxu1 %vm275_vm0, %v1192_v22  ;;  %v1202_v54 = vld [vmem:[%s1523_s2 + $0x20] sm:$0xff]   ;;  %v1203_v0 = vld [vmem:[%s1523_s2 + $0x28] sm:$0xff]   ;;  %v1204_v8 = vld [vmem:[%s1523_s2 + $0x30] sm:$0xff]  }
  0x2c   :  { %1132 = vmatpush3.bf16.msra.mxu1 %v1198_v36  ;;  %v1205_v18 = vld [vmem:[%s1523_s2 + $0x38] sm:$0xff]   ;;  %p1214_p4 = pnand %p1213_p3, %p1207_p0 }
  0x2d   :  { %1133 = vmatprep.subr.bf16.mxu1 %v1230_v37 }
  0x30   :  { %1134 = vmatpush3.bf16.msra.mxu1 %v1199_v38 }
  0x31   :  { %1135 = vmatprep.subr.bf16.mxu1 %v1230_v37 }
  0x32   :  { %1084 = vmatmul.mubr.msk.bf16.gmra.mrb[16].mxu0 %vm275_vm0, %v1175_v21  ;;  %1120 = vmatmul.mubr.msk.bf16.gmra.mrb[16].mxu1 %vm275_vm0, %v1193_v24 }
  0x33   :  { %1087 = vmatprep.mubr.msk.bf16.mxu0 %vm275_vm0, %v1176_v23  ;;  %1123 = vmatprep.mubr.msk.bf16.mxu1 %vm275_vm0, %v1194_v26 }
  0x34   :  { %1136 = vmatpush3.bf16.msra.mxu1 %v1200_v39 }
  0x35   :  { %1137 = vmatprep.subr.bf16.mxu1 %v1230_v37 }
  0x38   :  { %1138 = vmatpush3.bf16.msra.mxu1 %v1201_v40 }
  0x39   :  { %1139 = vmatprep.subr.bf16.mxu1 %v1230_v37 }
  0x3a   :  { %1088 = vmatmul.mubr.msk.bf16.gmra.mrb[20].mxu0 %vm275_vm0, %v1177_v25  ;;  %1124 = vmatmul.mubr.msk.bf16.gmra.mrb[20].mxu1 %vm275_vm0, %v1195_v28 }
  0x3b   :  { %1091 = vmatprep.mubr.msk.bf16.mxu0 %vm275_vm0, %v1178_v27  ;;  %1127 = vmatprep.mubr.msk.bf16.mxu1 %vm275_vm0, %v1196_v30 }
  0x3c   :  { %1140 = vmatpush3.bf16.msra.mxu1 %v1202_v54 }
  0x3d   :  { %1141 = vmatprep.subr.bf16.mxu1 %v1230_v37 }
  0x40   :  { %1142 = vmatpush3.bf16.msra.mxu1 %v1203_v0 }
  0x41   :  { %1143 = vmatprep.subr.bf16.mxu1 %v1230_v37 }
  0x42   :  { %1092 = vmatmul.mubr.msk.bf16.gmra.mrb[24].mxu0 %vm275_vm0, %v1179_v29  ;;  %1128 = vmatmul.mubr.msk.bf16.gmra.mrb[24].mxu1 %vm275_vm0, %v1197_v32 }
  0x43   :  { %1095 = vmatprep.mubr.msk.bf16.mxu0 %vm275_vm0, %v1180_v31  ;;  %1147 = vmatprep.mubr.msk.bf16.mxu1 %vm1231_vm1, %v1230_v37 }
  0x44   :  { %1144 = vmatpush3.bf16.msra.mxu1 %v1204_v8 }
  0x45   :  { %1145 = vmatprep.subr.bf16.mxu1 %v1230_v37 }
  0x48   :  { %1146 = vmatpush3.bf16.msra.mxu1 %v1205_v18 }
  0x4a   :  { %1096 = vmatmul.mubr.msk.bf16.gmra.mrb[28].mxu0 %vm275_vm0, %v1181_v33 }
  0x4b   :  { %1099 = vmatprep.mubr.msk.bf16.mxu0 %vm275_vm0, %v1182_v34 }
  0x52   :  { %1100 = vmatmul.mubr.msk.bf16.gmra.mrb[32].mxu0 %vm275_vm0, %v1183_v35 }
  0xe5   :  { %v1069_v41 = vpop.f32.mrb[0].mxu0  ;;  %v1410_v49 = vpop.f32.mrb[0].mxu1 }
  0xe6   :  { %v406_v42 = vpop.f32.mrb[1].mxu0  ;;  %v663_v47 = vmax.f32 %v1069_v41, 0.0  ;;  %v1412_v53 = vpop.f32.mrb[1].mxu1 }
  0xe7   :  { %v1070_v43 = vpop.f32.mrb[2].mxu0  ;;  %v661_v45 = vmax.f32 %v406_v42, 0.0  ;;  %v1417_v56 = vpop.f32.mrb[2].mxu1 }
  0xe8   :  { %v409_v44 = vpop.f32.mrb[3].mxu0  ;;  %v664_v50 = vmax.f32 %v1070_v43, 0.0  ;;  %v1419_v60 = vpop.f32.mrb[3].mxu1 }
  0xe9   :  { %v662_v46 = vmax.f32 %v409_v44, 0.0 }
  0xeb   :  { %v725_v48 = vadd.f32 %v662_v46, %v661_v45 }
  0xed   :  { %v726_v51 = vadd.f32 %v725_v48, %v663_v47  ;;  %v1073_v52 = vpop.f32.mrb[4].mxu0  ;;  %v1424_v3 = vpop.f32.mrb[4].mxu1 }
  0xee   :  { %v422_v55 = vpop.f32.mrb[5].mxu0  ;;  %v667_v1 = vmax.f32 %v1073_v52, 0.0  ;;  %v1426_v7 = vpop.f32.mrb[5].mxu1 }
  0xef   :  { %v665_v57 = vmax.f32 %v422_v55, 0.0  ;;  %v727_v58 = vadd.f32 %v726_v51, %v664_v50  ;;  %v1074_v59 = vpop.f32.mrb[6].mxu0  ;;  %v1431_v10 = vpop.f32.mrb[6].mxu1 }
  0xf0   :  { %v425_v61 = vpop.f32.mrb[7].mxu0  ;;  %v668_v4 = vmax.f32 %v1074_v59, 0.0  ;;  %v1433_v14 = vpop.f32.mrb[7].mxu1 }
  0xf1   :  { %v728_v62 = vadd.f32 %v727_v58, %v665_v57  ;;  %v666_v63 = vmax.f32 %v425_v61, 0.0 }
  0xf3   :  { %v729_v2 = vadd.f32 %v728_v62, %v666_v63 }
  0xf5   :  { %v730_v5 = vadd.f32 %v729_v2, %v667_v1  ;;  %v1077_v6 = vpop.f32.mrb[8].mxu0  ;;  %v1438_v21 = vpop.f32.mrb[8].mxu1 }
  0xf6   :  { %v438_v9 = vpop.f32.mrb[9].mxu0  ;;  %v671_v19 = vmax.f32 %v1077_v6, 0.0  ;;  %v1440_v25 = vpop.f32.mrb[9].mxu1 }
  0xf7   :  { %v669_v11 = vmax.f32 %v438_v9, 0.0  ;;  %v731_v12 = vadd.f32 %v730_v5, %v668_v4  ;;  %v1078_v13 = vpop.f32.mrb[10].mxu0  ;;  %v1442_v27 = vpop.f32.mrb[10].mxu1 }
  0xf8   :  { %v441_v15 = vpop.f32.mrb[11].mxu0  ;;  %v672_v22 = vmax.f32 %v1078_v13, 0.0  ;;  %v1444_v31 = vpop.f32.mrb[11].mxu1 }
  0xf9   :  { %v732_v16 = vadd.f32 %v731_v12, %v669_v11  ;;  %v670_v17 = vmax.f32 %v441_v15, 0.0 }
  0xfb   :  { %v733_v20 = vadd.f32 %v732_v16, %v670_v17 }
  0xfd   :  { %v734_v23 = vadd.f32 %v733_v20, %v671_v19  ;;  %v1081_v24 = vpop.f32.mrb[12].mxu0  ;;  %v1446_v37 = vpop.f32.mrb[12].mxu1 }
  0xfe   :  { %v454_v26 = vpop.f32.mrb[13].mxu0  ;;  %v675_v35 = vmax.f32 %v1081_v24, 0.0  ;;  %v1448_v41 = vpop.f32.mrb[13].mxu1 }
  0xff   :  { %v673_v28 = vmax.f32 %v454_v26, 0.0  ;;  %v735_v29 = vadd.f32 %v734_v23, %v672_v22  ;;  %v1082_v30 = vpop.f32.mrb[14].mxu0  ;;  %v1450_v43 = vpop.f32.mrb[14].mxu1 }
 0x100   :  { %v457_v32 = vpop.f32.mrb[15].mxu0  ;;  %v676_v38 = vmax.f32 %v1082_v30, 0.0  ;;  %v1452_v47 = vpop.f32.mrb[15].mxu1 }
 0x101   :  { %v736_v33 = vadd.f32 %v735_v29, %v673_v28  ;;  %v674_v34 = vmax.f32 %v457_v32, 0.0 }
 0x103   :  { %v737_v36 = vadd.f32 %v736_v33, %v674_v34 }
 0x105   :  { %v738_v39 = vadd.f32 %v737_v36, %v675_v35  ;;  %v1085_v40 = vpop.f32.mrb[16].mxu0  ;;  %v1454_v55 = vpop.f32.mrb[16].mxu1 }
 0x106   :  { %v470_v42 = vpop.f32.mrb[17].mxu0  ;;  %v679_v52 = vmax.f32 %v1085_v40, 0.0  ;;  %v1456_v61 = vpop.f32.mrb[17].mxu1 }
 0x107   :  { %v677_v44 = vmax.f32 %v470_v42, 0.0  ;;  %v739_v45 = vadd.f32 %v738_v39, %v676_v38  ;;  %v1086_v46 = vpop.f32.mrb[18].mxu0  ;;  %v1458_v63 = vpop.f32.mrb[18].mxu1 }
 0x108   :  { %v473_v48 = vpop.f32.mrb[19].mxu0  ;;  %v680_v57 = vmax.f32 %v1086_v46, 0.0  ;;  %v1460_v4 = vpop.f32.mrb[19].mxu1 }
 0x109   :  { %v740_v50 = vadd.f32 %v739_v45, %v677_v44  ;;  %v678_v51 = vmax.f32 %v473_v48, 0.0 }
 0x10b   :  { %v741_v54 = vadd.f32 %v740_v50, %v678_v51 }
 0x10d   :  { %v742_v58 = vadd.f32 %v741_v54, %v679_v52  ;;  %v1089_v59 = vpop.f32.mrb[20].mxu0  ;;  %v1462_v12 = vpop.f32.mrb[20].mxu1 }
 0x10e   :  { %v486_v62 = vpop.f32.mrb[21].mxu0  ;;  %v683_v9 = vmax.f32 %v1089_v59, 0.0  ;;  %v1464_v17 = vpop.f32.mrb[21].mxu1 }
 0x10f   :  { %v681_v0 = vmax.f32 %v486_v62, 0.0  ;;  %v743_v1 = vadd.f32 %v742_v58, %v680_v57  ;;  %v1090_v2 = vpop.f32.mrb[22].mxu0  ;;  %v1466_v19 = vpop.f32.mrb[22].mxu1 }
 0x110   :  { %v489_v5 = vpop.f32.mrb[23].mxu0  ;;  %v684_v13 = vmax.f32 %v1090_v2, 0.0  ;;  %v1468_v24 = vpop.f32.mrb[23].mxu1 }
 0x111   :  { %v744_v6 = vadd.f32 %v743_v1, %v681_v0  ;;  %v682_v8 = vmax.f32 %v489_v5, 0.0 }
 0x113   :  { %v745_v11 = vadd.f32 %v744_v6, %v682_v8 }
 0x115   :  { %v746_v15 = vadd.f32 %v745_v11, %v683_v9  ;;  %v1093_v16 = vpop.f32.mrb[24].mxu0  ;;  %v1470_v33 = vpop.f32.mrb[24].mxu1 }
 0x116   :  { %v502_v18 = vpop.f32.mrb[25].mxu0  ;;  %v687_v30 = vmax.f32 %v1093_v16, 0.0  ;;  %v1472_v38 = vpop.f32.mrb[25].mxu1 }
 0x117   :  { %v685_v20 = vmax.f32 %v502_v18, 0.0  ;;  %v747_v22 = vadd.f32 %v746_v15, %v684_v13  ;;  %v1094_v23 = vpop.f32.mrb[26].mxu0  ;;  %v1474_v40 = vpop.f32.mrb[26].mxu1  ;;  %v697_v15 = vmax.f32 %v1412_v53, 0.0  ;;  %v704_v53 = vmax.f32 %v1431_v10, 0.0 }
 0x118   :  { %v505_v26 = vpop.f32.mrb[27].mxu0  ;;  %v688_v34 = vmax.f32 %v1094_v23, 0.0  ;;  %v1476_v46 = vpop.f32.mrb[27].mxu1  ;;  %v711_v10 = vmax.f32 %v1446_v37, 0.0 }
 0x119   :  { %v748_v28 = vadd.f32 %v747_v22, %v685_v20  ;;  %v686_v29 = vmax.f32 %v505_v26, 0.0  ;;  %v698_v20 = vmax.f32 %v1419_v60, 0.0  ;;  %v699_v22 = vmax.f32 %v1410_v49, 0.0 }
 0x11a   :  { %v700_v26 = vmax.f32 %v1417_v56, 0.0  ;;  %v705_v60 = vmax.f32 %v1440_v25, 0.0  ;;  %v707_v56 = vmax.f32 %v1438_v21, 0.0  ;;  %v712_v25 = vmax.f32 %v1450_v43, 0.0 }
 0x11b   :  { %v749_v32 = vadd.f32 %v748_v28, %v686_v29  ;;  %v701_v29 = vmax.f32 %v1426_v7, 0.0  ;;  %v708_v7 = vmax.f32 %v1442_v27, 0.0  ;;  %v715_v27 = vmax.f32 %v1454_v55, 0.0 }
 0x11c   :  { %v718_v43 = vmax.f32 %v1468_v24, 0.0  ;;  %v721_v55 = vmax.f32 %v1472_v38, 0.0  ;;  %v724_v24 = vmax.f32 %v1474_v40, 0.0  ;;  %v1005_v40 = vld [vmem:[%s1524_s3] ss:$0 sm:$0xff] }
 0x11d   :  { %v750_v35 = vadd.f32 %v749_v32, %v687_v30  ;;  %v1097_v36 = vpop.f32.mrb[28].mxu0 }
 0x11e   :  { %v518_v39 = vpop.f32.mrb[29].mxu0  ;;  %v691_v52 = vmax.f32 %v1097_v36, 0.0 }
 0x11f   :  { %v689_v42 = vmax.f32 %v518_v39, 0.0  ;;  %v751_v44 = vadd.f32 %v750_v35, %v688_v34  ;;  %v1098_v45 = vpop.f32.mrb[30].mxu0  ;;  %v702_v34 = vmax.f32 %v1433_v14, 0.0  ;;  %v703_v35 = vmax.f32 %v1424_v3, 0.0 }
 0x120   :  { %v521_v48 = vpop.f32.mrb[31].mxu0  ;;  %v692_v57 = vmax.f32 %v1098_v45, 0.0  ;;  %v709_v14 = vmax.f32 %v1448_v41, 0.0  ;;  %v716_v41 = vmax.f32 %v1458_v63, 0.0 }
 0x121   :  { %v752_v50 = vadd.f32 %v751_v44, %v689_v42  ;;  %v690_v51 = vmax.f32 %v521_v48, 0.0  ;;  %v706_v44 = vmax.f32 %v1444_v31, 0.0  ;;  %v713_v31 = vmax.f32 %v1456_v61, 0.0 }
 0x123   :  { %v753_v54 = vadd.f32 %v752_v50, %v690_v51  ;;  %v710_v51 = vmax.f32 %v1452_v47, 0.0  ;;  %v717_v47 = vmax.f32 %v1464_v17, 0.0  ;;  %v723_v17 = vmax.f32 %v1470_v33, 0.0 }
 0x125   :  { %v754_v58 = vadd.f32 %v753_v54, %v691_v52  ;;  %v1101_v59 = vpop.f32.mrb[32].mxu0 }
 0x126   :  { %v534_v62 = vpop.f32.mrb[33].mxu0  ;;  %v695_v8 = vmax.f32 %v1101_v59, 0.0 }
 0x127   :  { %v755_v0 = vadd.f32 %v754_v58, %v692_v57  ;;  %v1102_v1 = vpop.f32.mrb[34].mxu0  ;;  %v693_v5 = vmax.f32 %v534_v62, 0.0  ;;  %v714_v58 = vmax.f32 %v1460_v4, 0.0 }
 0x128   :  { %v537_v2 = vpop.f32.mrb[35].mxu0  ;;  %v696_v11 = vmax.f32 %v1102_v1, 0.0 }
 0x129   :  { %v694_v6 = vmax.f32 %v537_v2, 0.0  ;;  %v756_v37 = vrot.slane %v755_v0, 4 }
 0x12b   :  { %v762_v9 = vadd.f32 %v694_v6, %v693_v5  ;;  %v719_v5 = vmax.f32 %v1462_v12, 0.0  ;;  %v757_v6 = vadd.f32 %v756_v37, %v755_v0 }
 0x12d   :  { %v763_v13 = vadd.f32 %v762_v9, %v695_v8  ;;  %v720_v8 = vmax.f32 %v1466_v19, 0.0 }
 0x12f   :  { %v764_v16 = vadd.f32 %v763_v13, %v696_v11  ;;  %v758_v11 = vrot.slane %v757_v6, 2  ;;  %v722_v13 = vmax.f32 %v1476_v46, 0.0 }
 0x131   :  { %v765_v18 = vadd.f32 %v764_v16, %v697_v15  ;;  %v759_v16 = vadd.f32 %v758_v11, %v757_v6 }
 0x133   :  { %v766_v23 = vadd.f32 %v765_v18, %v698_v20  ;;  %v760_v20 = vrot.slane %v759_v16, 1 }
 0x135   :  { %v767_v28 = vadd.f32 %v766_v23, %v699_v22  ;;  %v761_v19 = vadd.f32 %v760_v20, %v759_v16 }
 0x137   :  { %v768_v30 = vadd.f32 %v767_v28, %v700_v26  ;;  %v799_v38 = vmul.f32 0.00390625, %v761_v19 }
 0x139   :  { %v769_v32 = vadd.f32 %v768_v30, %v701_v29  ;;  %v801_v30 = vpack.c.bf16 %v799_v38, %v799_v38 }
 0x13b   :  { %v770_v36 = vadd.f32 %v769_v32, %v702_v34  ;;  %v828_v33 = vunpack.c.l.b16 %v801_v30 }
 0x13d   :  { %v771_v39 = vadd.f32 %v770_v36, %v703_v35 }
 0x13f   :  { %v772_v42 = vadd.f32 %v771_v39, %v704_v53 }
 0x141   :  { %v773_v49 = vadd.f32 %v772_v42, %v705_v60 }
 0x143   :  { %v774_v45 = vadd.f32 %v773_v49, %v706_v44 }
 0x145   :  { %v775_v48 = vadd.f32 %v774_v45, %v707_v56 }
 0x147   :  { %v776_v50 = vadd.f32 %v775_v48, %v708_v7 }
 0x149   :  { %v777_v3 = vadd.f32 %v776_v50, %v709_v14 }
 0x14b   :  { %v778_v52 = vadd.f32 %v777_v3, %v710_v51 }
 0x14d   :  { %v779_v54 = vadd.f32 %v778_v52, %v711_v10 }
 0x14f   :  { %v780_v57 = vadd.f32 %v779_v54, %v712_v25 }
 0x151   :  { %v781_v21 = vadd.f32 %v780_v57, %v713_v31 }
 0x153   :  { %v782_v59 = vadd.f32 %v781_v21, %v714_v58 }
 0x155   :  { %v783_v62 = vadd.f32 %v782_v59, %v715_v27 }
 0x157   :  { %v784_v1 = vadd.f32 %v783_v62, %v716_v41 }
 0x159   :  { %v785_v2 = vadd.f32 %v784_v1, %v717_v47 }
 0x15b   :  { %v786_v61 = vadd.f32 %v785_v2, %v718_v43 }
 0x15d   :  { %v787_v4 = vadd.f32 %v786_v61, %v719_v5 }
 0x15f   :  { %v788_v9 = vadd.f32 %v787_v4, %v720_v8 }
 0x161   :  { %v789_v63 = vadd.f32 %v788_v9, %v721_v55 }
 0x163   :  { %v790_v15 = vadd.f32 %v789_v63, %v722_v13 }
 0x165   :  { %v791_v18 = vadd.f32 %v790_v15, %v723_v17 }
 0x167   :  { %v792_v12 = vadd.f32 %v791_v18, %v724_v24 }
 0x169   :  { %v793_v0 = vrot.slane %v792_v12, 4 }
 0x16b   :  { %v794_v22 = vadd.f32 %v793_v0, %v792_v12 }
 0x16d   :  { %v795_v23 = vrot.slane %v794_v22, 2 }
 0x16f   :  { %v796_v26 = vadd.f32 %v795_v23, %v794_v22 }
 0x171   :  { %v797_v28 = vrot.slane %v796_v26, 1 }
 0x173   :  { %v798_v29 = vadd.f32 %v797_v28, %v796_v26 }
 0x175   :  { %v800_v32 = vmul.f32 0.00390625, %v798_v29 }
 0x177   :  { %v802_v46 = vpack.c.bf16 %v800_v32, %v800_v32 }
 0x179   :  { %v829_v34 = vunpack.c.l.b16 %v802_v46 }
 0x17b   :  { %v831_v35 = vsel %vm830_vm2, %v829_v34, %v828_v33 }
 0x17c   :  { %v832_v36 = vpack.c.b16 %v831_v35, %v831_v35 }
 0x17e   :  { %1148 = vmatmul.mubr.bf16.vlgmr.msra.gmra.mrb[28].mxu1 %v832_v36 }
 0x251   :  { %v916_v53 = vpop.f32.mrb[28].mxu1 }
 0x252   :  { %v917_v39 = vadd.f32 %v1005_v40, %v916_v53  ;;  %v1149_v60 = vpop.f32.mrb[29].mxu1 }
 0x253   :  { %v919_v42 = vpop.f32.mrb[30].mxu1 }
 0x254   :  { %922 = vst [vmem:[#allocation2] sm:$0x3] %v917_v39  ;;  %v1150_v49 = vpop.f32.mrb[31].mxu1 }
 0x255   :  { %1217 = shalt.err (!%p1214_p4)
}
 0x256   :  { %s1218_s3 = scalar_lea.hbm %s1525_s4, 32 }
 0x257   :  { %p1219_p5 = scmp.ne.s32.totalorder %s1525_s4, %s1218_s3  ;;  %p1222_p6 = scmp.lt.u32.totalorder %s1218_s3, %s1525_s4 }
 0x259   :  { %p1224_p7 = pnand %p1222_p6, %p1219_p5 }
 0x25b   :  { %1227 = shalt.err (!%p1224_p7)
}
 0x25c   :  { %932 = dma.vmem_to_hbm [thread:$0]  %s930_s23, 32, %s1525_s4, [#allocation3]  }
 0x25d   :  { %1228 = dma.done.wait [#allocation3], 32  }
 0x25e   :  { %1229 = vsyncadd [#allocation3], 4294967264 }
 0x25f   :  { %936 = vsyncpa [#allocation3], 1 }

</bundles_post_ra>
